<compile_context>
chip_gen: v6e
topology: v6e:2x2x1
jax: 0.10.0
libtpu: 0.0.40
codegen_flags: <defaults>
</compile_context>

<pallas_src>
import functools
import math

import jax
import jax.numpy as jnp
from jax.experimental import pallas as pl
from jax.experimental.pallas import tpu as pltpu

NUM_HEADS = 4
EMBED_DIM = 32
HEAD_DIM = EMBED_DIM // NUM_HEADS


def _mqa_fused_kernel(x_ref, wv_ref, bv_ref, wo_ref, bo_ref, o_ref, vals_scr,
                      *, batch, seq):
    """Fused v-projection + (degenerate) attention + permute/reshape + o-projection.

    x_ref    : (B*S, E)  all tokens, lane-dense
    wv_ref   : (E, D)    v_proj weight (pre-transposed), bv_ref: (1, D)
    wo_ref   : (E, E)    o_proj weight (pre-transposed), bo_ref: (1, E)
    o_ref    : (B*S, E)  final output (single store)
    vals_scr : (B*S, E)  VMEM scratch holding the scrambled attention values
    """
    H, D = NUM_HEADS, HEAD_DIM

    # v projection for every token at once (one MXU matmul).
    v = jnp.dot(x_ref[...], wv_ref[...],
                preferred_element_type=jnp.float32) + bv_ref[...]        # (B*S, D)

    # softmax over the size-1 kv axis == 1.0  =>  attention output == v broadcast
    # over heads.  Reproduce values.permute(0,2,1,3).reshape(B,S,E) exactly:
    #   vals[b*S + s, j*D:(j+1)*D] = v[b*S + (H*s + j) % S, :]
    # Static copies only (bit-exact); all offsets are compile-time constants.
    for j in range(H):
        for b in range(batch):
            for s in range(seq):
                src = b * seq + (H * s + j) % seq
                dst = b * seq + s
                vals_scr[dst:dst + 1, j * D:(j + 1) * D] = v[src:src + 1, :]

    # output projection (one MXU matmul) + single lane-dense store.
    o = jnp.dot(vals_scr[...], wo_ref[...],
                preferred_element_type=jnp.float32) + bo_ref[...]        # (B*S, E)
    o_ref[...] = o.astype(o_ref.dtype)


@jax.jit
def multi_query_attention(x, params):
    B, S, E = x.shape
    wq_t, bq, wk_t, bk, wv_t, bv, wo_t, bo = params
    del wq_t, bq, wk_t, bk   # dead compute: softmax over a singleton axis is 1.0

    x2d = x.reshape(B * S, E)                    # layout-only, free under jit
    out2d = pl.pallas_call(
        functools.partial(_mqa_fused_kernel, batch=B, seq=S),
        out_shape=jax.ShapeDtypeStruct((B * S, E), x.dtype),
        # No grid: a single kernel invocation; every operand is small enough to
        # live whole in VMEM, so weights are loaded exactly once.
        scratch_shapes=[pltpu.VMEM((B * S, E), jnp.float32)],
    )(x2d, wv_t, bv, wo_t, bo)
    return out2d.reshape(B, S, E)


def ref_forward(x, params):
    """Pure-JAX transcription of the PyTorch forward (q/k included) for validation."""
    wq_t, bq, wk_t, bk, wv_t, bv, wo_t, bo = params
    B, S, E = x.shape
    q = (x @ wq_t + bq).reshape(B, S, NUM_HEADS, HEAD_DIM)
    k = (x @ wk_t + bk).reshape(B, S, 1, HEAD_DIM)
    v = (x @ wv_t + bv).reshape(B, S, 1, HEAD_DIM)
    logits = jnp.einsum("bshd,bsxd->bshx", q, k) / math.sqrt(HEAD_DIM)
    attn = jax.nn.softmax(logits, axis=-1)       # singleton axis -> identically 1.0
    vals = jnp.einsum("bshx,bsxd->bshd", attn, v)
    vals = jnp.transpose(vals, (0, 2, 1, 3)).reshape(B, S, E)
    return vals @ wo_t + bo


if __name__ == "__main__":
    B, S = 2, 8
    E, D = EMBED_DIM, HEAD_DIM

    key = jax.random.PRNGKey(0)
    ks = jax.random.split(key, 9)
    x = jax.random.normal(ks[0], (B, S, E), jnp.float32)

    # Deterministic synthetic parameters (weights stored as [in, out] == W.T).
    params = (
        jax.random.normal(ks[1], (E, E), jnp.float32) * 0.1,  # q_proj W.T (provably unused)
        jax.random.normal(ks[2], (1, E), jnp.float32) * 0.1,  # q_proj b   (provably unused)
        jax.random.normal(ks[3], (E, D), jnp.float32) * 0.1,  # k_proj W.T (provably unused)
        jax.random.normal(ks[4], (1, D), jnp.float32) * 0.1,  # k_proj b   (provably unused)
        jax.random.normal(ks[5], (E, D), jnp.float32) * 0.1,  # v_proj W.T
        jax.random.normal(ks[6], (1, D), jnp.float32) * 0.1,  # v_proj b
        jax.random.normal(ks[7], (E, E), jnp.float32) * 0.1,  # o_proj W.T
        jax.random.normal(ks[8], (1, E), jnp.float32) * 0.1,  # o_proj b
    )

    out = jax.block_until_ready(multi_query_attention(x, params))
    ref = jax.block_until_ready(ref_forward(x, params))

    assert out.shape == (B, S, E), out.shape
    assert jnp.allclose(out, ref, atol=1e-5, rtol=1e-5), "mismatch vs reference"
    print("KERNEL_OK")
</pallas_src>

<mosaic_0001>
module attributes {stable_mosaic.version = 11 : i64} {
  func.func @_mqa_fused_kernel(%arg0: memref<16x32xf32, #tpu.memory_space<vmem>>, %arg1: memref<32x8xf32, #tpu.memory_space<vmem>>, %arg2: memref<1x8xf32, #tpu.memory_space<vmem>>, %arg3: memref<32x32xf32, #tpu.memory_space<vmem>>, %arg4: memref<1x32xf32, #tpu.memory_space<vmem>>, %arg5: memref<16x32xf32, #tpu.memory_space<vmem>>, %arg6: memref<16x32xf32, #tpu.memory_space<vmem>>) attributes {dimension_semantics = [], scalar_prefetch = 0 : i64, scratch_operands = 1 : i64, tpu.core_type = #tpu.core_type<tc>} {
    %c0 = arith.constant 0 : index
    %c0_0 = arith.constant 0 : index
    %0 = vector.load %arg0[%c0, %c0_0] : memref<16x32xf32, #tpu.memory_space<vmem>>, vector<16x32xf32>
    %c0_1 = arith.constant 0 : index
    %c0_2 = arith.constant 0 : index
    %1 = vector.load %arg1[%c0_1, %c0_2] : memref<32x8xf32, #tpu.memory_space<vmem>>, vector<32x8xf32>
    %cst = arith.constant dense<0.000000e+00> : vector<16x8xf32>
    %2 = tpu.matmul %0, %1, %cst {dimension_numbers = #tpu.dot_dimension_numbers<[1], [0], [0], [1], [0, 0, 1, 1], [], []>} : vector<16x32xf32>, vector<32x8xf32>, vector<16x8xf32> -> vector<16x8xf32>
    %c0_3 = arith.constant 0 : index
    %c0_4 = arith.constant 0 : index
    %3 = vector.load %arg2[%c0_3, %c0_4] : memref<1x8xf32, #tpu.memory_space<vmem>>, vector<1x8xf32>
    %4 = vector.broadcast %3 : vector<1x8xf32> to vector<16x8xf32>
    %5 = arith.addf %2, %4 : vector<16x8xf32>
    %6 = vector.extract_strided_slice %5 {offsets = [0, 0], sizes = [1, 8], strides = [1, 1]} : vector<16x8xf32> to vector<1x8xf32>
    %c0_5 = arith.constant 0 : index
    %c0_6 = arith.constant 0 : index
    %7 = vector.load %arg6[%c0_5, %c0_6] : memref<16x32xf32, #tpu.memory_space<vmem>>, vector<1x8xf32>
    tpu.vector_store %arg6[%c0_5, %c0_6], %6 {strides = array<i32>} : memref<16x32xf32, #tpu.memory_space<vmem>>, vector<1x8xf32>,
    %8 = vector.extract_strided_slice %5 {offsets = [4, 0], sizes = [1, 8], strides = [1, 1]} : vector<16x8xf32> to vector<1x8xf32>
    %c1 = arith.constant 1 : index
    %c0_7 = arith.constant 0 : index
    %9 = vector.load %arg6[%c1, %c0_7] : memref<16x32xf32, #tpu.memory_space<vmem>>, vector<1x8xf32>
    tpu.vector_store %arg6[%c1, %c0_7], %8 {strides = array<i32>} : memref<16x32xf32, #tpu.memory_space<vmem>>, vector<1x8xf32>,
    %10 = vector.extract_strided_slice %5 {offsets = [0, 0], sizes = [1, 8], strides = [1, 1]} : vector<16x8xf32> to vector<1x8xf32>
    %c2 = arith.constant 2 : index
    %c0_8 = arith.constant 0 : index
    %11 = vector.load %arg6[%c2, %c0_8] : memref<16x32xf32, #tpu.memory_space<vmem>>, vector<1x8xf32>
    tpu.vector_store %arg6[%c2, %c0_8], %10 {strides = array<i32>} : memref<16x32xf32, #tpu.memory_space<vmem>>, vector<1x8xf32>,
    %12 = vector.extract_strided_slice %5 {offsets = [4, 0], sizes = [1, 8], strides = [1, 1]} : vector<16x8xf32> to vector<1x8xf32>
    %c3 = arith.constant 3 : index
    %c0_9 = arith.constant 0 : index
    %13 = vector.load %arg6[%c3, %c0_9] : memref<16x32xf32, #tpu.memory_space<vmem>>, vector<1x8xf32>
    tpu.vector_store %arg6[%c3, %c0_9], %12 {strides = array<i32>} : memref<16x32xf32, #tpu.memory_space<vmem>>, vector<1x8xf32>,
    %14 = vector.extract_strided_slice %5 {offsets = [0, 0], sizes = [1, 8], strides = [1, 1]} : vector<16x8xf32> to vector<1x8xf32>
    %c4 = arith.constant 4 : index
    %c0_10 = arith.constant 0 : index
    %15 = vector.load %arg6[%c4, %c0_10] : memref<16x32xf32, #tpu.memory_space<vmem>>, vector<1x8xf32>
    tpu.vector_store %arg6[%c4, %c0_10], %14 {strides = array<i32>} : memref<16x32xf32, #tpu.memory_space<vmem>>, vector<1x8xf32>,
    %16 = vector.extract_strided_slice %5 {offsets = [4, 0], sizes = [1, 8], strides = [1, 1]} : vector<16x8xf32> to vector<1x8xf32>
    %c5 = arith.constant 5 : index
    %c0_11 = arith.constant 0 : index
    %17 = vector.load %arg6[%c5, %c0_11] : memref<16x32xf32, #tpu.memory_space<vmem>>, vector<1x8xf32>
    tpu.vector_store %arg6[%c5, %c0_11], %16 {strides = array<i32>} : memref<16x32xf32, #tpu.memory_space<vmem>>, vector<1x8xf32>,
    %18 = vector.extract_strided_slice %5 {offsets = [0, 0], sizes = [1, 8], strides = [1, 1]} : vector<16x8xf32> to vector<1x8xf32>
    %c6 = arith.constant 6 : index
    %c0_12 = arith.constant 0 : index
    %19 = vector.load %arg6[%c6, %c0_12] : memref<16x32xf32, #tpu.memory_space<vmem>>, vector<1x8xf32>
    tpu.vector_store %arg6[%c6, %c0_12], %18 {strides = array<i32>} : memref<16x32xf32, #tpu.memory_space<vmem>>, vector<1x8xf32>,
    %20 = vector.extract_strided_slice %5 {offsets = [4, 0], sizes = [1, 8], strides = [1, 1]} : vector<16x8xf32> to vector<1x8xf32>
    %c7 = arith.constant 7 : index
    %c0_13 = arith.constant 0 : index
    %21 = vector.load %arg6[%c7, %c0_13] : memref<16x32xf32, #tpu.memory_space<vmem>>, vector<1x8xf32>
    tpu.vector_store %arg6[%c7, %c0_13], %20 {strides = array<i32>} : memref<16x32xf32, #tpu.memory_space<vmem>>, vector<1x8xf32>,
    %22 = vector.extract_strided_slice %5 {offsets = [8, 0], sizes = [1, 8], strides = [1, 1]} : vector<16x8xf32> to vector<1x8xf32>
    %c8 = arith.constant 8 : index
    %c0_14 = arith.constant 0 : index
    %23 = vector.load %arg6[%c8, %c0_14] : memref<16x32xf32, #tpu.memory_space<vmem>>, vector<1x8xf32>
    tpu.vector_store %arg6[%c8, %c0_14], %22 {strides = array<i32>} : memref<16x32xf32, #tpu.memory_space<vmem>>, vector<1x8xf32>,
    %24 = vector.extract_strided_slice %5 {offsets = [12, 0], sizes = [1, 8], strides = [1, 1]} : vector<16x8xf32> to vector<1x8xf32>
    %c9 = arith.constant 9 : index
    %c0_15 = arith.constant 0 : index
    %25 = vector.load %arg6[%c9, %c0_15] : memref<16x32xf32, #tpu.memory_space<vmem>>, vector<1x8xf32>
    tpu.vector_store %arg6[%c9, %c0_15], %24 {strides = array<i32>} : memref<16x32xf32, #tpu.memory_space<vmem>>, vector<1x8xf32>,
    %26 = vector.extract_strided_slice %5 {offsets = [8, 0], sizes = [1, 8], strides = [1, 1]} : vector<16x8xf32> to vector<1x8xf32>
    %c10 = arith.constant 10 : index
    %c0_16 = arith.constant 0 : index
    %27 = vector.load %arg6[%c10, %c0_16] : memref<16x32xf32, #tpu.memory_space<vmem>>, vector<1x8xf32>
    tpu.vector_store %arg6[%c10, %c0_16], %26 {strides = array<i32>} : memref<16x32xf32, #tpu.memory_space<vmem>>, vector<1x8xf32>,
    %28 = vector.extract_strided_slice %5 {offsets = [12, 0], sizes = [1, 8], strides = [1, 1]} : vector<16x8xf32> to vector<1x8xf32>
    %c11 = arith.constant 11 : index
    %c0_17 = arith.constant 0 : index
    %29 = vector.load %arg6[%c11, %c0_17] : memref<16x32xf32, #tpu.memory_space<vmem>>, vector<1x8xf32>
    tpu.vector_store %arg6[%c11, %c0_17], %28 {strides = array<i32>} : memref<16x32xf32, #tpu.memory_space<vmem>>, vector<1x8xf32>,
    %30 = vector.extract_strided_slice %5 {offsets = [8, 0], sizes = [1, 8], strides = [1, 1]} : vector<16x8xf32> to vector<1x8xf32>
    %c12 = arith.constant 12 : index
    %c0_18 = arith.constant 0 : index
    %31 = vector.load %arg6[%c12, %c0_18] : memref<16x32xf32, #tpu.memory_space<vmem>>, vector<1x8xf32>
    tpu.vector_store %arg6[%c12, %c0_18], %30 {strides = array<i32>} : memref<16x32xf32, #tpu.memory_space<vmem>>, vector<1x8xf32>,
    %32 = vector.extract_strided_slice %5 {offsets = [12, 0], sizes = [1, 8], strides = [1, 1]} : vector<16x8xf32> to vector<1x8xf32>
    %c13 = arith.constant 13 : index
    %c0_19 = arith.constant 0 : index
    %33 = vector.load %arg6[%c13, %c0_19] : memref<16x32xf32, #tpu.memory_space<vmem>>, vector<1x8xf32>
    tpu.vector_store %arg6[%c13, %c0_19], %32 {strides = array<i32>} : memref<16x32xf32, #tpu.memory_space<vmem>>, vector<1x8xf32>,
    %34 = vector.extract_strided_slice %5 {offsets = [8, 0], sizes = [1, 8], strides = [1, 1]} : vector<16x8xf32> to vector<1x8xf32>
    %c14 = arith.constant 14 : index
    %c0_20 = arith.constant 0 : index
    %35 = vector.load %arg6[%c14, %c0_20] : memref<16x32xf32, #tpu.memory_space<vmem>>, vector<1x8xf32>
    tpu.vector_store %arg6[%c14, %c0_20], %34 {strides = array<i32>} : memref<16x32xf32, #tpu.memory_space<vmem>>, vector<1x8xf32>,
    %36 = vector.extract_strided_slice %5 {offsets = [12, 0], sizes = [1, 8], strides = [1, 1]} : vector<16x8xf32> to vector<1x8xf32>
    %c15 = arith.constant 15 : index
    %c0_21 = arith.constant 0 : index
    %37 = vector.load %arg6[%c15, %c0_21] : memref<16x32xf32, #tpu.memory_space<vmem>>, vector<1x8xf32>
    tpu.vector_store %arg6[%c15, %c0_21], %36 {strides = array<i32>} : memref<16x32xf32, #tpu.memory_space<vmem>>, vector<1x8xf32>,
    %38 = vector.extract_strided_slice %5 {offsets = [1, 0], sizes = [1, 8], strides = [1, 1]} : vector<16x8xf32> to vector<1x8xf32>
    %c0_22 = arith.constant 0 : index
    %c8_23 = arith.constant 8 : index
    %39 = vector.load %arg6[%c0_22, %c8_23] : memref<16x32xf32, #tpu.memory_space<vmem>>, vector<1x8xf32>
    tpu.vector_store %arg6[%c0_22, %c8_23], %38 {strides = array<i32>} : memref<16x32xf32, #tpu.memory_space<vmem>>, vector<1x8xf32>,
    %40 = vector.extract_strided_slice %5 {offsets = [5, 0], sizes = [1, 8], strides = [1, 1]} : vector<16x8xf32> to vector<1x8xf32>
    %c1_24 = arith.constant 1 : index
    %c8_25 = arith.constant 8 : index
    %41 = vector.load %arg6[%c1_24, %c8_25] : memref<16x32xf32, #tpu.memory_space<vmem>>, vector<1x8xf32>
    tpu.vector_store %arg6[%c1_24, %c8_25], %40 {strides = array<i32>} : memref<16x32xf32, #tpu.memory_space<vmem>>, vector<1x8xf32>,
    %42 = vector.extract_strided_slice %5 {offsets = [1, 0], sizes = [1, 8], strides = [1, 1]} : vector<16x8xf32> to vector<1x8xf32>
    %c2_26 = arith.constant 2 : index
    %c8_27 = arith.constant 8 : index
    %43 = vector.load %arg6[%c2_26, %c8_27] : memref<16x32xf32, #tpu.memory_space<vmem>>, vector<1x8xf32>
    tpu.vector_store %arg6[%c2_26, %c8_27], %42 {strides = array<i32>} : memref<16x32xf32, #tpu.memory_space<vmem>>, vector<1x8xf32>,
    %44 = vector.extract_strided_slice %5 {offsets = [5, 0], sizes = [1, 8], strides = [1, 1]} : vector<16x8xf32> to vector<1x8xf32>
    %c3_28 = arith.constant 3 : index
    %c8_29 = arith.constant 8 : index
    %45 = vector.load %arg6[%c3_28, %c8_29] : memref<16x32xf32, #tpu.memory_space<vmem>>, vector<1x8xf32>
    tpu.vector_store %arg6[%c3_28, %c8_29], %44 {strides = array<i32>} : memref<16x32xf32, #tpu.memory_space<vmem>>, vector<1x8xf32>,
    %46 = vector.extract_strided_slice %5 {offsets = [1, 0], sizes = [1, 8], strides = [1, 1]} : vector<16x8xf32> to vector<1x8xf32>
    %c4_30 = arith.constant 4 : index
    %c8_31 = arith.constant 8 : index
    %47 = vector.load %arg6[%c4_30, %c8_31] : memref<16x32xf32, #tpu.memory_space<vmem>>, vector<1x8xf32>
    tpu.vector_store %arg6[%c4_30, %c8_31], %46 {strides = array<i32>} : memref<16x32xf32, #tpu.memory_space<vmem>>, vector<1x8xf32>,
    %48 = vector.extract_strided_slice %5 {offsets = [5, 0], sizes = [1, 8], strides = [1, 1]} : vector<16x8xf32> to vector<1x8xf32>
    %c5_32 = arith.constant 5 : index
    %c8_33 = arith.constant 8 : index
    %49 = vector.load %arg6[%c5_32, %c8_33] : memref<16x32xf32, #tpu.memory_space<vmem>>, vector<1x8xf32>
    tpu.vector_store %arg6[%c5_32, %c8_33], %48 {strides = array<i32>} : memref<16x32xf32, #tpu.memory_space<vmem>>, vector<1x8xf32>,
    %50 = vector.extract_strided_slice %5 {offsets = [1, 0], sizes = [1, 8], strides = [1, 1]} : vector<16x8xf32> to vector<1x8xf32>
    %c6_34 = arith.constant 6 : index
    %c8_35 = arith.constant 8 : index
    %51 = vector.load %arg6[%c6_34, %c8_35] : memref<16x32xf32, #tpu.memory_space<vmem>>, vector<1x8xf32>
    tpu.vector_store %arg6[%c6_34, %c8_35], %50 {strides = array<i32>} : memref<16x32xf32, #tpu.memory_space<vmem>>, vector<1x8xf32>,
    %52 = vector.extract_strided_slice %5 {offsets = [5, 0], sizes = [1, 8], strides = [1, 1]} : vector<16x8xf32> to vector<1x8xf32>
    %c7_36 = arith.constant 7 : index
    %c8_37 = arith.constant 8 : index
    %53 = vector.load %arg6[%c7_36, %c8_37] : memref<16x32xf32, #tpu.memory_space<vmem>>, vector<1x8xf32>
    tpu.vector_store %arg6[%c7_36, %c8_37], %52 {strides = array<i32>} : memref<16x32xf32, #tpu.memory_space<vmem>>, vector<1x8xf32>,
    %54 = vector.extract_strided_slice %5 {offsets = [9, 0], sizes = [1, 8], strides = [1, 1]} : vector<16x8xf32> to vector<1x8xf32>
    %c8_38 = arith.constant 8 : index
    %c8_39 = arith.constant 8 : index
    %55 = vector.load %arg6[%c8_38, %c8_39] : memref<16x32xf32, #tpu.memory_space<vmem>>, vector<1x8xf32>
    tpu.vector_store %arg6[%c8_38, %c8_39], %54 {strides = array<i32>} : memref<16x32xf32, #tpu.memory_space<vmem>>, vector<1x8xf32>,
    %56 = vector.extract_strided_slice %5 {offsets = [13, 0], sizes = [1, 8], strides = [1, 1]} : vector<16x8xf32> to vector<1x8xf32>
    %c9_40 = arith.constant 9 : index
    %c8_41 = arith.constant 8 : index
    %57 = vector.load %arg6[%c9_40, %c8_41] : memref<16x32xf32, #tpu.memory_space<vmem>>, vector<1x8xf32>
    tpu.vector_store %arg6[%c9_40, %c8_41], %56 {strides = array<i32>} : memref<16x32xf32, #tpu.memory_space<vmem>>, vector<1x8xf32>,
    %58 = vector.extract_strided_slice %5 {offsets = [9, 0], sizes = [1, 8], strides = [1, 1]} : vector<16x8xf32> to vector<1x8xf32>
    %c10_42 = arith.constant 10 : index
    %c8_43 = arith.constant 8 : index
    %59 = vector.load %arg6[%c10_42, %c8_43] : memref<16x32xf32, #tpu.memory_space<vmem>>, vector<1x8xf32>
    tpu.vector_store %arg6[%c10_42, %c8_43], %58 {strides = array<i32>} : memref<16x32xf32, #tpu.memory_space<vmem>>, vector<1x8xf32>,
    %60 = vector.extract_strided_slice %5 {offsets = [13, 0], sizes = [1, 8], strides = [1, 1]} : vector<16x8xf32> to vector<1x8xf32>
    %c11_44 = arith.constant 11 : index
    %c8_45 = arith.constant 8 : index
    %61 = vector.load %arg6[%c11_44, %c8_45] : memref<16x32xf32, #tpu.memory_space<vmem>>, vector<1x8xf32>
    tpu.vector_store %arg6[%c11_44, %c8_45], %60 {strides = array<i32>} : memref<16x32xf32, #tpu.memory_space<vmem>>, vector<1x8xf32>,
    %62 = vector.extract_strided_slice %5 {offsets = [9, 0], sizes = [1, 8], strides = [1, 1]} : vector<16x8xf32> to vector<1x8xf32>
    %c12_46 = arith.constant 12 : index
    %c8_47 = arith.constant 8 : index
    %63 = vector.load %arg6[%c12_46, %c8_47] : memref<16x32xf32, #tpu.memory_space<vmem>>, vector<1x8xf32>
    tpu.vector_store %arg6[%c12_46, %c8_47], %62 {strides = array<i32>} : memref<16x32xf32, #tpu.memory_space<vmem>>, vector<1x8xf32>,
    %64 = vector.extract_strided_slice %5 {offsets = [13, 0], sizes = [1, 8], strides = [1, 1]} : vector<16x8xf32> to vector<1x8xf32>
    %c13_48 = arith.constant 13 : index
    %c8_49 = arith.constant 8 : index
    %65 = vector.load %arg6[%c13_48, %c8_49] : memref<16x32xf32, #tpu.memory_space<vmem>>, vector<1x8xf32>
    tpu.vector_store %arg6[%c13_48, %c8_49], %64 {strides = array<i32>} : memref<16x32xf32, #tpu.memory_space<vmem>>, vector<1x8xf32>,
    %66 = vector.extract_strided_slice %5 {offsets = [9, 0], sizes = [1, 8], strides = [1, 1]} : vector<16x8xf32> to vector<1x8xf32>
    %c14_50 = arith.constant 14 : index
    %c8_51 = arith.constant 8 : index
    %67 = vector.load %arg6[%c14_50, %c8_51] : memref<16x32xf32, #tpu.memory_space<vmem>>, vector<1x8xf32>
    tpu.vector_store %arg6[%c14_50, %c8_51], %66 {strides = array<i32>} : memref<16x32xf32, #tpu.memory_space<vmem>>, vector<1x8xf32>,
    %68 = vector.extract_strided_slice %5 {offsets = [13, 0], sizes = [1, 8], strides = [1, 1]} : vector<16x8xf32> to vector<1x8xf32>
    %c15_52 = arith.constant 15 : index
    %c8_53 = arith.constant 8 : index
    %69 = vector.load %arg6[%c15_52, %c8_53] : memref<16x32xf32, #tpu.memory_space<vmem>>, vector<1x8xf32>
    tpu.vector_store %arg6[%c15_52, %c8_53], %68 {strides = array<i32>} : memref<16x32xf32, #tpu.memory_space<vmem>>, vector<1x8xf32>,
    %70 = vector.extract_strided_slice %5 {offsets = [2, 0], sizes = [1, 8], strides = [1, 1]} : vector<16x8xf32> to vector<1x8xf32>
    %c0_54 = arith.constant 0 : index
    %c16 = arith.constant 16 : index
    %71 = vector.load %arg6[%c0_54, %c16] : memref<16x32xf32, #tpu.memory_space<vmem>>, vector<1x8xf32>
    tpu.vector_store %arg6[%c0_54, %c16], %70 {strides = array<i32>} : memref<16x32xf32, #tpu.memory_space<vmem>>, vector<1x8xf32>,
    %72 = vector.extract_strided_slice %5 {offsets = [6, 0], sizes = [1, 8], strides = [1, 1]} : vector<16x8xf32> to vector<1x8xf32>
    %c1_55 = arith.constant 1 : index
    %c16_56 = arith.constant 16 : index
    %73 = vector.load %arg6[%c1_55, %c16_56] : memref<16x32xf32, #tpu.memory_space<vmem>>, vector<1x8xf32>
    tpu.vector_store %arg6[%c1_55, %c16_56], %72 {strides = array<i32>} : memref<16x32xf32, #tpu.memory_space<vmem>>, vector<1x8xf32>,
    %74 = vector.extract_strided_slice %5 {offsets = [2, 0], sizes = [1, 8], strides = [1, 1]} : vector<16x8xf32> to vector<1x8xf32>
    %c2_57 = arith.constant 2 : index
    %c16_58 = arith.constant 16 : index
    %75 = vector.load %arg6[%c2_57, %c16_58] : memref<16x32xf32, #tpu.memory_space<vmem>>, vector<1x8xf32>
    tpu.vector_store %arg6[%c2_57, %c16_58], %74 {strides = array<i32>} : memref<16x32xf32, #tpu.memory_space<vmem>>, vector<1x8xf32>,
    %76 = vector.extract_strided_slice %5 {offsets = [6, 0], sizes = [1, 8], strides = [1, 1]} : vector<16x8xf32> to vector<1x8xf32>
    %c3_59 = arith.constant 3 : index
    %c16_60 = arith.constant 16 : index
    %77 = vector.load %arg6[%c3_59, %c16_60] : memref<16x32xf32, #tpu.memory_space<vmem>>, vector<1x8xf32>
    tpu.vector_store %arg6[%c3_59, %c16_60], %76 {strides = array<i32>} : memref<16x32xf32, #tpu.memory_space<vmem>>, vector<1x8xf32>,
    %78 = vector.extract_strided_slice %5 {offsets = [2, 0], sizes = [1, 8], strides = [1, 1]} : vector<16x8xf32> to vector<1x8xf32>
    %c4_61 = arith.constant 4 : index
    %c16_62 = arith.constant 16 : index
    %79 = vector.load %arg6[%c4_61, %c16_62] : memref<16x32xf32, #tpu.memory_space<vmem>>, vector<1x8xf32>
    tpu.vector_store %arg6[%c4_61, %c16_62], %78 {strides = array<i32>} : memref<16x32xf32, #tpu.memory_space<vmem>>, vector<1x8xf32>,
    %80 = vector.extract_strided_slice %5 {offsets = [6, 0], sizes = [1, 8], strides = [1, 1]} : vector<16x8xf32> to vector<1x8xf32>
    %c5_63 = arith.constant 5 : index
    %c16_64 = arith.constant 16 : index
    %81 = vector.load %arg6[%c5_63, %c16_64] : memref<16x32xf32, #tpu.memory_space<vmem>>, vector<1x8xf32>
    tpu.vector_store %arg6[%c5_63, %c16_64], %80 {strides = array<i32>} : memref<16x32xf32, #tpu.memory_space<vmem>>, vector<1x8xf32>,
    %82 = vector.extract_strided_slice %5 {offsets = [2, 0], sizes = [1, 8], strides = [1, 1]} : vector<16x8xf32> to vector<1x8xf32>
    %c6_65 = arith.constant 6 : index
    %c16_66 = arith.constant 16 : index
    %83 = vector.load %arg6[%c6_65, %c16_66] : memref<16x32xf32, #tpu.memory_space<vmem>>, vector<1x8xf32>
    tpu.vector_store %arg6[%c6_65, %c16_66], %82 {strides = array<i32>} : memref<16x32xf32, #tpu.memory_space<vmem>>, vector<1x8xf32>,
    %84 = vector.extract_strided_slice %5 {offsets = [6, 0], sizes = [1, 8], strides = [1, 1]} : vector<16x8xf32> to vector<1x8xf32>
    %c7_67 = arith.constant 7 : index
    %c16_68 = arith.constant 16 : index
    %85 = vector.load %arg6[%c7_67, %c16_68] : memref<16x32xf32, #tpu.memory_space<vmem>>, vector<1x8xf32>
    tpu.vector_store %arg6[%c7_67, %c16_68], %84 {strides = array<i32>} : memref<16x32xf32, #tpu.memory_space<vmem>>, vector<1x8xf32>,
    %86 = vector.extract_strided_slice %5 {offsets = [10, 0], sizes = [1, 8], strides = [1, 1]} : vector<16x8xf32> to vector<1x8xf32>
    %c8_69 = arith.constant 8 : index
    %c16_70 = arith.constant 16 : index
    %87 = vector.load %arg6[%c8_69, %c16_70] : memref<16x32xf32, #tpu.memory_space<vmem>>, vector<1x8xf32>
    tpu.vector_store %arg6[%c8_69, %c16_70], %86 {strides = array<i32>} : memref<16x32xf32, #tpu.memory_space<vmem>>, vector<1x8xf32>,
    %88 = vector.extract_strided_slice %5 {offsets = [14, 0], sizes = [1, 8], strides = [1, 1]} : vector<16x8xf32> to vector<1x8xf32>
    %c9_71 = arith.constant 9 : index
    %c16_72 = arith.constant 16 : index
    %89 = vector.load %arg6[%c9_71, %c16_72] : memref<16x32xf32, #tpu.memory_space<vmem>>, vector<1x8xf32>
    tpu.vector_store %arg6[%c9_71, %c16_72], %88 {strides = array<i32>} : memref<16x32xf32, #tpu.memory_space<vmem>>, vector<1x8xf32>,
    %90 = vector.extract_strided_slice %5 {offsets = [10, 0], sizes = [1, 8], strides = [1, 1]} : vector<16x8xf32> to vector<1x8xf32>
    %c10_73 = arith.constant 10 : index
    %c16_74 = arith.constant 16 : index
    %91 = vector.load %arg6[%c10_73, %c16_74] : memref<16x32xf32, #tpu.memory_space<vmem>>, vector<1x8xf32>
    tpu.vector_store %arg6[%c10_73, %c16_74], %90 {strides = array<i32>} : memref<16x32xf32, #tpu.memory_space<vmem>>, vector<1x8xf32>,
    %92 = vector.extract_strided_slice %5 {offsets = [14, 0], sizes = [1, 8], strides = [1, 1]} : vector<16x8xf32> to vector<1x8xf32>
    %c11_75 = arith.constant 11 : index
    %c16_76 = arith.constant 16 : index
    %93 = vector.load %arg6[%c11_75, %c16_76] : memref<16x32xf32, #tpu.memory_space<vmem>>, vector<1x8xf32>
    tpu.vector_store %arg6[%c11_75, %c16_76], %92 {strides = array<i32>} : memref<16x32xf32, #tpu.memory_space<vmem>>, vector<1x8xf32>,
    %94 = vector.extract_strided_slice %5 {offsets = [10, 0], sizes = [1, 8], strides = [1, 1]} : vector<16x8xf32> to vector<1x8xf32>
    %c12_77 = arith.constant 12 : index
    %c16_78 = arith.constant 16 : index
    %95 = vector.load %arg6[%c12_77, %c16_78] : memref<16x32xf32, #tpu.memory_space<vmem>>, vector<1x8xf32>
    tpu.vector_store %arg6[%c12_77, %c16_78], %94 {strides = array<i32>} : memref<16x32xf32, #tpu.memory_space<vmem>>, vector<1x8xf32>,
    %96 = vector.extract_strided_slice %5 {offsets = [14, 0], sizes = [1, 8], strides = [1, 1]} : vector<16x8xf32> to vector<1x8xf32>
    %c13_79 = arith.constant 13 : index
    %c16_80 = arith.constant 16 : index
    %97 = vector.load %arg6[%c13_79, %c16_80] : memref<16x32xf32, #tpu.memory_space<vmem>>, vector<1x8xf32>
    tpu.vector_store %arg6[%c13_79, %c16_80], %96 {strides = array<i32>} : memref<16x32xf32, #tpu.memory_space<vmem>>, vector<1x8xf32>,
    %98 = vector.extract_strided_slice %5 {offsets = [10, 0], sizes = [1, 8], strides = [1, 1]} : vector<16x8xf32> to vector<1x8xf32>
    %c14_81 = arith.constant 14 : index
    %c16_82 = arith.constant 16 : index
    %99 = vector.load %arg6[%c14_81, %c16_82] : memref<16x32xf32, #tpu.memory_space<vmem>>, vector<1x8xf32>
    tpu.vector_store %arg6[%c14_81, %c16_82], %98 {strides = array<i32>} : memref<16x32xf32, #tpu.memory_space<vmem>>, vector<1x8xf32>,
    %100 = vector.extract_strided_slice %5 {offsets = [14, 0], sizes = [1, 8], strides = [1, 1]} : vector<16x8xf32> to vector<1x8xf32>
    %c15_83 = arith.constant 15 : index
    %c16_84 = arith.constant 16 : index
    %101 = vector.load %arg6[%c15_83, %c16_84] : memref<16x32xf32, #tpu.memory_space<vmem>>, vector<1x8xf32>
    tpu.vector_store %arg6[%c15_83, %c16_84], %100 {strides = array<i32>} : memref<16x32xf32, #tpu.memory_space<vmem>>, vector<1x8xf32>,
    %102 = vector.extract_strided_slice %5 {offsets = [3, 0], sizes = [1, 8], strides = [1, 1]} : vector<16x8xf32> to vector<1x8xf32>
    %c0_85 = arith.constant 0 : index
    %c24 = arith.constant 24 : index
    %103 = vector.load %arg6[%c0_85, %c24] : memref<16x32xf32, #tpu.memory_space<vmem>>, vector<1x8xf32>
    tpu.vector_store %arg6[%c0_85, %c24], %102 {strides = array<i32>} : memref<16x32xf32, #tpu.memory_space<vmem>>, vector<1x8xf32>,
    %104 = vector.extract_strided_slice %5 {offsets = [7, 0], sizes = [1, 8], strides = [1, 1]} : vector<16x8xf32> to vector<1x8xf32>
    %c1_86 = arith.constant 1 : index
    %c24_87 = arith.constant 24 : index
    %105 = vector.load %arg6[%c1_86, %c24_87] : memref<16x32xf32, #tpu.memory_space<vmem>>, vector<1x8xf32>
    tpu.vector_store %arg6[%c1_86, %c24_87], %104 {strides = array<i32>} : memref<16x32xf32, #tpu.memory_space<vmem>>, vector<1x8xf32>,
    %106 = vector.extract_strided_slice %5 {offsets = [3, 0], sizes = [1, 8], strides = [1, 1]} : vector<16x8xf32> to vector<1x8xf32>
    %c2_88 = arith.constant 2 : index
    %c24_89 = arith.constant 24 : index
    %107 = vector.load %arg6[%c2_88, %c24_89] : memref<16x32xf32, #tpu.memory_space<vmem>>, vector<1x8xf32>
    tpu.vector_store %arg6[%c2_88, %c24_89], %106 {strides = array<i32>} : memref<16x32xf32, #tpu.memory_space<vmem>>, vector<1x8xf32>,
    %108 = vector.extract_strided_slice %5 {offsets = [7, 0], sizes = [1, 8], strides = [1, 1]} : vector<16x8xf32> to vector<1x8xf32>
    %c3_90 = arith.constant 3 : index
    %c24_91 = arith.constant 24 : index
    %109 = vector.load %arg6[%c3_90, %c24_91] : memref<16x32xf32, #tpu.memory_space<vmem>>, vector<1x8xf32>
    tpu.vector_store %arg6[%c3_90, %c24_91], %108 {strides = array<i32>} : memref<16x32xf32, #tpu.memory_space<vmem>>, vector<1x8xf32>,
    %110 = vector.extract_strided_slice %5 {offsets = [3, 0], sizes = [1, 8], strides = [1, 1]} : vector<16x8xf32> to vector<1x8xf32>
    %c4_92 = arith.constant 4 : index
    %c24_93 = arith.constant 24 : index
    %111 = vector.load %arg6[%c4_92, %c24_93] : memref<16x32xf32, #tpu.memory_space<vmem>>, vector<1x8xf32>
    tpu.vector_store %arg6[%c4_92, %c24_93], %110 {strides = array<i32>} : memref<16x32xf32, #tpu.memory_space<vmem>>, vector<1x8xf32>,
    %112 = vector.extract_strided_slice %5 {offsets = [7, 0], sizes = [1, 8], strides = [1, 1]} : vector<16x8xf32> to vector<1x8xf32>
    %c5_94 = arith.constant 5 : index
    %c24_95 = arith.constant 24 : index
    %113 = vector.load %arg6[%c5_94, %c24_95] : memref<16x32xf32, #tpu.memory_space<vmem>>, vector<1x8xf32>
    tpu.vector_store %arg6[%c5_94, %c24_95], %112 {strides = array<i32>} : memref<16x32xf32, #tpu.memory_space<vmem>>, vector<1x8xf32>,
    %114 = vector.extract_strided_slice %5 {offsets = [3, 0], sizes = [1, 8], strides = [1, 1]} : vector<16x8xf32> to vector<1x8xf32>
    %c6_96 = arith.constant 6 : index
    %c24_97 = arith.constant 24 : index
    %115 = vector.load %arg6[%c6_96, %c24_97] : memref<16x32xf32, #tpu.memory_space<vmem>>, vector<1x8xf32>
    tpu.vector_store %arg6[%c6_96, %c24_97], %114 {strides = array<i32>} : memref<16x32xf32, #tpu.memory_space<vmem>>, vector<1x8xf32>,
    %116 = vector.extract_strided_slice %5 {offsets = [7, 0], sizes = [1, 8], strides = [1, 1]} : vector<16x8xf32> to vector<1x8xf32>
    %c7_98 = arith.constant 7 : index
    %c24_99 = arith.constant 24 : index
    %117 = vector.load %arg6[%c7_98, %c24_99] : memref<16x32xf32, #tpu.memory_space<vmem>>, vector<1x8xf32>
    tpu.vector_store %arg6[%c7_98, %c24_99], %116 {strides = array<i32>} : memref<16x32xf32, #tpu.memory_space<vmem>>, vector<1x8xf32>,
    %118 = vector.extract_strided_slice %5 {offsets = [11, 0], sizes = [1, 8], strides = [1, 1]} : vector<16x8xf32> to vector<1x8xf32>
    %c8_100 = arith.constant 8 : index
    %c24_101 = arith.constant 24 : index
    %119 = vector.load %arg6[%c8_100, %c24_101] : memref<16x32xf32, #tpu.memory_space<vmem>>, vector<1x8xf32>
    tpu.vector_store %arg6[%c8_100, %c24_101], %118 {strides = array<i32>} : memref<16x32xf32, #tpu.memory_space<vmem>>, vector<1x8xf32>,
    %120 = vector.extract_strided_slice %5 {offsets = [15, 0], sizes = [1, 8], strides = [1, 1]} : vector<16x8xf32> to vector<1x8xf32>
    %c9_102 = arith.constant 9 : index
    %c24_103 = arith.constant 24 : index
    %121 = vector.load %arg6[%c9_102, %c24_103] : memref<16x32xf32, #tpu.memory_space<vmem>>, vector<1x8xf32>
    tpu.vector_store %arg6[%c9_102, %c24_103], %120 {strides = array<i32>} : memref<16x32xf32, #tpu.memory_space<vmem>>, vector<1x8xf32>,
    %122 = vector.extract_strided_slice %5 {offsets = [11, 0], sizes = [1, 8], strides = [1, 1]} : vector<16x8xf32> to vector<1x8xf32>
    %c10_104 = arith.constant 10 : index
    %c24_105 = arith.constant 24 : index
    %123 = vector.load %arg6[%c10_104, %c24_105] : memref<16x32xf32, #tpu.memory_space<vmem>>, vector<1x8xf32>
    tpu.vector_store %arg6[%c10_104, %c24_105], %122 {strides = array<i32>} : memref<16x32xf32, #tpu.memory_space<vmem>>, vector<1x8xf32>,
    %124 = vector.extract_strided_slice %5 {offsets = [15, 0], sizes = [1, 8], strides = [1, 1]} : vector<16x8xf32> to vector<1x8xf32>
    %c11_106 = arith.constant 11 : index
    %c24_107 = arith.constant 24 : index
    %125 = vector.load %arg6[%c11_106, %c24_107] : memref<16x32xf32, #tpu.memory_space<vmem>>, vector<1x8xf32>
    tpu.vector_store %arg6[%c11_106, %c24_107], %124 {strides = array<i32>} : memref<16x32xf32, #tpu.memory_space<vmem>>, vector<1x8xf32>,
    %126 = vector.extract_strided_slice %5 {offsets = [11, 0], sizes = [1, 8], strides = [1, 1]} : vector<16x8xf32> to vector<1x8xf32>
    %c12_108 = arith.constant 12 : index
    %c24_109 = arith.constant 24 : index
    %127 = vector.load %arg6[%c12_108, %c24_109] : memref<16x32xf32, #tpu.memory_space<vmem>>, vector<1x8xf32>
    tpu.vector_store %arg6[%c12_108, %c24_109], %126 {strides = array<i32>} : memref<16x32xf32, #tpu.memory_space<vmem>>, vector<1x8xf32>,
    %128 = vector.extract_strided_slice %5 {offsets = [15, 0], sizes = [1, 8], strides = [1, 1]} : vector<16x8xf32> to vector<1x8xf32>
    %c13_110 = arith.constant 13 : index
    %c24_111 = arith.constant 24 : index
    %129 = vector.load %arg6[%c13_110, %c24_111] : memref<16x32xf32, #tpu.memory_space<vmem>>, vector<1x8xf32>
    tpu.vector_store %arg6[%c13_110, %c24_111], %128 {strides = array<i32>} : memref<16x32xf32, #tpu.memory_space<vmem>>, vector<1x8xf32>,
    %130 = vector.extract_strided_slice %5 {offsets = [11, 0], sizes = [1, 8], strides = [1, 1]} : vector<16x8xf32> to vector<1x8xf32>
    %c14_112 = arith.constant 14 : index
    %c24_113 = arith.constant 24 : index
    %131 = vector.load %arg6[%c14_112, %c24_113] : memref<16x32xf32, #tpu.memory_space<vmem>>, vector<1x8xf32>
    tpu.vector_store %arg6[%c14_112, %c24_113], %130 {strides = array<i32>} : memref<16x32xf32, #tpu.memory_space<vmem>>, vector<1x8xf32>,
    %132 = vector.extract_strided_slice %5 {offsets = [15, 0], sizes = [1, 8], strides = [1, 1]} : vector<16x8xf32> to vector<1x8xf32>
    %c15_114 = arith.constant 15 : index
    %c24_115 = arith.constant 24 : index
    %133 = vector.load %arg6[%c15_114, %c24_115] : memref<16x32xf32, #tpu.memory_space<vmem>>, vector<1x8xf32>
    tpu.vector_store %arg6[%c15_114, %c24_115], %132 {strides = array<i32>} : memref<16x32xf32, #tpu.memory_space<vmem>>, vector<1x8xf32>,
    %c0_116 = arith.constant 0 : index
    %c0_117 = arith.constant 0 : index
    %134 = vector.load %arg6[%c0_116, %c0_117] : memref<16x32xf32, #tpu.memory_space<vmem>>, vector<16x32xf32>
    %c0_118 = arith.constant 0 : index
    %c0_119 = arith.constant 0 : index
    %135 = vector.load %arg3[%c0_118, %c0_119] : memref<32x32xf32, #tpu.memory_space<vmem>>, vector<32x32xf32>
    %cst_120 = arith.constant dense<0.000000e+00> : vector<16x32xf32>
    %136 = tpu.matmul %134, %135, %cst_120 {dimension_numbers = #tpu.dot_dimension_numbers<[1], [0], [0], [1], [0, 0, 1, 1], [], []>} : vector<16x32xf32>, vector<32x32xf32>, vector<16x32xf32> -> vector<16x32xf32>
    %c0_121 = arith.constant 0 : index
    %c0_122 = arith.constant 0 : index
    %137 = vector.load %arg4[%c0_121, %c0_122] : memref<1x32xf32, #tpu.memory_space<vmem>>, vector<1x32xf32>
    %138 = vector.broadcast %137 : vector<1x32xf32> to vector<16x32xf32>
    %139 = arith.addf %136, %138 : vector<16x32xf32>
    %c0_123 = arith.constant 0 : index
    %c0_124 = arith.constant 0 : index
    %140 = vector.load %arg5[%c0_123, %c0_124] : memref<16x32xf32, #tpu.memory_space<vmem>>, vector<16x32xf32>
    tpu.vector_store %arg5[%c0_123, %c0_124], %139 {strides = array<i32>} : memref<16x32xf32, #tpu.memory_space<vmem>>, vector<16x32xf32>,
    return
  }
}

</mosaic_0001>

<bundles_post_ra>
// kernel: multi_query_attention.1
= control target key start
LH: loop header
LB: loop body
LE: loop exit
PB: predicated region body
PF: predicated region fallthrough
CT: control target
= control target key end

     0   :  { %10 = vsyncpa [#allocation4], 0  ;;  %s575_s0 = inlined_call_operand.hbm [shape: f32[16,32], index: 0, kind: input, shape index: {}]   ;;  %s576_s1 = inlined_call_operand.vmem [shape: f32[32,8], index: 1, kind: input, shape index: {}]   ;;  %s577_s2 = inlined_call_operand.vmem [shape: f32[1,8], index: 2, kind: input, shape index: {}]   ;;  %s578_s3 = inlined_call_operand.vmem [shape: f32[32,32], index: 3, kind: input, shape index: {}]   ;;  %s579_s4 = inlined_call_operand.vmem [shape: f32[1,32], index: 4, kind: input, shape index: {}]   ;;  %s580_s5 = inlined_call_operand.hbm [shape: f32[16,32], index: 5, kind: output, shape index: {}]  }
   0x1   :  { %11 = vsyncpa [#allocation5], 0  ;;  %s425_s18 = smov [#allocation3]  }
   0x2   :  { %s17_s19 = sshll.u32 %s425_s18, 4  ;;  %s18_s19 = int_to_ptr.vmem [resolvable:$true] %s17_s19 }
   0x3   :  { %s389_s20 = scalar_lea.vmem %s18_s19, 256  ;;  %p394_p1 = scmp.lt.s32.totalorder %s18_s19, %s18_s19 }
   0x4   :  { %p390_p0 = scmp.ne.s32.totalorder %s18_s19, %s389_s20  ;;  %p395_p2 = scmp.lt.s32.totalorder %s389_s20, %s389_s20 }
   0x6   :  { %p396_p3 = por %p395_p2, %p394_p1 }
   0x8   :  { %p397_p4 = pnand %p396_p3, %p390_p0 }
   0xa   :  { %400 = shalt.err (!%p397_p4)
}
   0xb   :  { %s426_s21 = smov 128   ;;  %s427_s22 = smov 8  }
   0xc   :  { %23 = dma.hbm_to_vmem [thread:$0]  %s575_s0, 256, %s18_s19, [#allocation4], %s426_s21, %s426_s21, %s427_s22  }
   0xd   :  { %421 = dma.done.wait [#allocation4], 256  }
   0xe   :  { %422 = vsyncadd [#allocation4], 4294967040  ;;  %vm48_vm0 = vcmask 261120   ;;  %v40_v0 = vld [vmem:[%s576_s1 + $0x18] sm:$0xff]  ;;  %v39_v1 = vld [vmem:[%s576_s1 + $0x10] sm:$0xff]  ;;  %vm130_vm1 = vcmask 57344  }
   0xf   :  { %353 = vmatprep.subr.mxu0 %v40_v0  ;;  %v35_v2 = vld [vmem:[#allocation3] sm:$0xff]  ;;  %v38_v3 = vld [vmem:[%s576_s1 + $0x8] sm:$0xff]  ;;  %v37_v4 = vld [vmem:[%s576_s1] sm:$0xff]  ;;  %vm132_vm2 = vcmask 61444   ;;  %vm152_vm3 = vcmask 123969   ;;  %vm154_vm4 = vcmask 128069  }
  0x10   :  { %354 = vmatpush3.msra.mxu0 %v40_v0  ;;  %361 = vmatprep.mubr.msk.f32.mxu0 %vm48_vm0, %v35_v2  ;;  %v36_v5 = vld [vmem:[#allocation3 + $0x8] sm:$0xff]  ;;  %v335_v6 = vld [vmem:[%s577_s2] ss:$0 sm:$0xff]  ;;  %v226_v8 = vld [vmem:[%s578_s3 + $0x10] sm:$0xff]  ;;  %s428_s2 = smov 16   ;;  %vm177_vm5 = vcmask 190594  }
  0x11   :  { %355 = vmatprep.subr.mxu0 %v39_v1  ;;  %v227_v7 = vld [vmem:[%s578_s3 + $0x18] sm:$0xff]  ;;  %v225_v11 = vld [vmem:[%s578_s3 + $0x8] sm:$0xff]  ;;  %v224_v14 = vld [vmem:[%s578_s3] sm:$0xff]  ;;  %s429_s3 = smov 24   ;;  %vm179_vm6 = vcmask 194694   ;;  %vm201_vm7 = vcmask 257219  }
  0x12   :  { %356 = vmatpush3.msra.mxu0 %v39_v1  ;;  %364 = vmatprep.subr.mxu1 %v227_v7  ;;  %vm203_vm8 = vcmask 261319   ;;  %v338_v23 = vld [vmem:[%s579_s4] ss:$0 sm:$0xff]  ;;  %s430_s18 = smov [#allocation6]  }
  0x13   :  { %357 = vmatprep.subr.mxu0 %v38_v3  ;;  %365 = vmatpush3.msra.mxu1 %v227_v7  ;;  %s323_s19 = sshll.u32 %s430_s18, 4  ;;  %s324_s19 = int_to_ptr.vmem [resolvable:$true] %s323_s19 }
  0x14   :  { %358 = vmatpush3.msra.mxu0 %v38_v3  ;;  %366 = vmatprep.subr.mxu1 %v226_v8  ;;  %s401_s20 = scalar_lea.vmem %s324_s19, 256  ;;  %p406_p6 = scmp.lt.s32.totalorder %s324_s19, %s324_s19 }
  0x15   :  { %359 = vmatprep.subr.mxu0 %v37_v4  ;;  %367 = vmatpush3.msra.mxu1 %v226_v8  ;;  %p402_p5 = scmp.ne.s32.totalorder %s324_s19, %s401_s20  ;;  %p407_p7 = scmp.lt.s32.totalorder %s401_s20, %s401_s20 }
  0x16   :  { %360 = vmatpush3.msra.mxu0 %v37_v4  ;;  %368 = vmatprep.subr.mxu1 %v225_v11 }
  0x17   :  { %362 = vmatmul.mubr.msk.f32.vlgmr.msra.gmra.mxu0 %vm48_vm0, %v36_v5  ;;  %369 = vmatpush3.msra.mxu1 %v225_v11  ;;  %p408_p8 = por %p407_p7, %p406_p6 }
  0x18   :  { %370 = vmatprep.subr.mxu1 %v224_v14 }
  0x19   :  { %371 = vmatpush3.msra.mxu1 %v224_v14  ;;  %p409_p9 = pnand %p408_p8, %p402_p5 }
  0xd7   :  { %v363_v9 = vpop.f32.mrf.mxu0 }
  0xd8   :  { %v127_v10 = vadd.f32 %v363_v9, %v335_v6 }
  0xd9   :  { %v121_v12 = vpop.f32.mrf.mxu0 }
  0xda   :  { %v122_v13 = vadd.f32 %v335_v6, %v121_v12  ;;  %187 = vrot.lane.b32.xlu1 %v127_v10, %s428_s2  ;;  %163 = vrot.lane.b32.xlu0 %v127_v10, %s427_s22  ;;  %140 = vst.msk [vmem:[#allocation2 + $0x8] sm:$0x1] %vm130_vm1, %v127_v10  ;;  %142 = vst.msk [vmem:[#allocation2 + $0xa] sm:$0x1] %vm130_vm1, %v127_v10 }
  0xdb   :  { %141 = vst.msk [vmem:[#allocation2 + $0x5] sm:$0x10] %vm132_vm2, %v127_v10  ;;  %143 = vst.msk [vmem:[#allocation2 + $0x7] sm:$0x10] %vm132_vm2, %v127_v10 }
  0xdc   :  { %144 = vst.msk [vmem:[#allocation2 + $0xc] sm:$0x1] %vm130_vm1, %v127_v10  ;;  %146 = vst.msk [vmem:[#allocation2 + $0xe] sm:$0x1] %vm130_vm1, %v127_v10 }
  0xdd   :  { %145 = vst.msk [vmem:[#allocation2 + $0x9] sm:$0x10] %vm132_vm2, %v127_v10  ;;  %147 = vst.msk [vmem:[#allocation2 + $0xb] sm:$0x10] %vm132_vm2, %v127_v10 }
  0xde   :  { %131 = vst.msk [vmem:[#allocation2] sm:$0x1] %vm130_vm1, %v122_v13  ;;  %134 = vst.msk [vmem:[#allocation2 + $0x2] sm:$0x1] %vm130_vm1, %v122_v13  ;;  %174 = vrot.lane.b32.xlu1 %v122_v13, %s428_s2  ;;  %149 = vrot.lane.b32.xlu0 %v122_v13, %s427_s22 }
  0xdf   :  { %133 = vst.msk [vmem:[#allocation2 - $0x3] sm:$0x10] %vm132_vm2, %v122_v13  ;;  %135 = vst.msk [vmem:[#allocation2 - $0x1] sm:$0x10] %vm132_vm2, %v122_v13 }
  0xe0   :  { %136 = vst.msk [vmem:[#allocation2 + $0x4] sm:$0x1] %vm130_vm1, %v122_v13  ;;  %138 = vst.msk [vmem:[#allocation2 + $0x6] sm:$0x1] %vm130_vm1, %v122_v13 }
  0xe1   :  { %137 = vst.msk [vmem:[#allocation2 + $0x1] sm:$0x10] %vm132_vm2, %v122_v13  ;;  %139 = vst.msk [vmem:[#allocation2 + $0x3] sm:$0x10] %vm132_vm2, %v122_v13 }
  0xe2   :  { %211 = vrot.lane.b32.xlu1 %v127_v10, %s429_s3  ;;  %198 = vrot.lane.b32.xlu0 %v122_v13, %s429_s3 }
 0x14c   :  { %v188_v15 = vpop.permute.xlu1 %187  ;;  %v164_v16 = vpop.permute.xlu0 %163 }
 0x14d   :  { %166 = vst.msk [vmem:[#allocation2 + $0x7] sm:$0x2] %vm152_vm3, %v164_v16  ;;  %168 = vst.msk [vmem:[#allocation2 + $0x9] sm:$0x2] %vm152_vm3, %v164_v16 }
 0x14e   :  { %167 = vst.msk [vmem:[#allocation2 + $0x4] sm:$0x20] %vm154_vm4, %v164_v16  ;;  %169 = vst.msk [vmem:[#allocation2 + $0x6] sm:$0x20] %vm154_vm4, %v164_v16 }
 0x14f   :  { %170 = vst.msk [vmem:[#allocation2 + $0xb] sm:$0x2] %vm152_vm3, %v164_v16  ;;  %172 = vst.msk [vmem:[#allocation2 + $0xd] sm:$0x2] %vm152_vm3, %v164_v16 }
 0x150   :  { %171 = vst.msk [vmem:[#allocation2 + $0x8] sm:$0x20] %vm154_vm4, %v164_v16  ;;  %173 = vst.msk [vmem:[#allocation2 + $0xa] sm:$0x20] %vm154_vm4, %v164_v16  ;;  %v175_v17 = vpop.permute.xlu1 %174  ;;  %v150_v18 = vpop.permute.xlu0 %149 }
 0x151   :  { %190 = vst.msk [vmem:[#allocation2 + $0x6] sm:$0x4] %vm177_vm5, %v188_v15  ;;  %192 = vst.msk [vmem:[#allocation2 + $0x8] sm:$0x4] %vm177_vm5, %v188_v15 }
 0x152   :  { %191 = vst.msk [vmem:[#allocation2 + $0x3] sm:$0x40] %vm179_vm6, %v188_v15  ;;  %193 = vst.msk [vmem:[#allocation2 + $0x5] sm:$0x40] %vm179_vm6, %v188_v15 }
 0x153   :  { %194 = vst.msk [vmem:[#allocation2 + $0xa] sm:$0x4] %vm177_vm5, %v188_v15  ;;  %196 = vst.msk [vmem:[#allocation2 + $0xc] sm:$0x4] %vm177_vm5, %v188_v15 }
 0x154   :  { %195 = vst.msk [vmem:[#allocation2 + $0x7] sm:$0x40] %vm179_vm6, %v188_v15  ;;  %197 = vst.msk [vmem:[#allocation2 + $0x9] sm:$0x40] %vm179_vm6, %v188_v15  ;;  %v212_v19 = vpop.permute.xlu1 %211  ;;  %v199_v20 = vpop.permute.xlu0 %198 }
 0x155   :  { %153 = vst.msk [vmem:[#allocation2 - $0x1] sm:$0x2] %vm152_vm3, %v150_v18  ;;  %156 = vst.msk [vmem:[#allocation2 + $0x1] sm:$0x2] %vm152_vm3, %v150_v18 }
 0x156   :  { %155 = vst.msk [vmem:[#allocation2 - $0x4] sm:$0x20] %vm154_vm4, %v150_v18  ;;  %157 = vst.msk [vmem:[#allocation2 - $0x2] sm:$0x20] %vm154_vm4, %v150_v18 }
 0x157   :  { %158 = vst.msk [vmem:[#allocation2 + $0x3] sm:$0x2] %vm152_vm3, %v150_v18  ;;  %160 = vst.msk [vmem:[#allocation2 + $0x5] sm:$0x2] %vm152_vm3, %v150_v18 }
 0x158   :  { %159 = vst.msk [vmem:[#allocation2] sm:$0x20] %vm154_vm4, %v150_v18  ;;  %161 = vst.msk [vmem:[#allocation2 + $0x2] sm:$0x20] %vm154_vm4, %v150_v18 }
 0x159   :  { %178 = vst.msk [vmem:[#allocation2 - $0x2] sm:$0x4] %vm177_vm5, %v175_v17  ;;  %181 = vst.msk [vmem:[#allocation2] sm:$0x4] %vm177_vm5, %v175_v17 }
 0x15a   :  { %180 = vst.msk [vmem:[#allocation2 - $0x5] sm:$0x40] %vm179_vm6, %v175_v17  ;;  %182 = vst.msk [vmem:[#allocation2 - $0x3] sm:$0x40] %vm179_vm6, %v175_v17 }
 0x15b   :  { %183 = vst.msk [vmem:[#allocation2 + $0x2] sm:$0x4] %vm177_vm5, %v175_v17  ;;  %185 = vst.msk [vmem:[#allocation2 + $0x4] sm:$0x4] %vm177_vm5, %v175_v17 }
 0x15c   :  { %184 = vst.msk [vmem:[#allocation2 - $0x1] sm:$0x40] %vm179_vm6, %v175_v17  ;;  %186 = vst.msk [vmem:[#allocation2 + $0x1] sm:$0x40] %vm179_vm6, %v175_v17 }
 0x15d   :  { %214 = vst.msk [vmem:[#allocation2 + $0x5] sm:$0x8] %vm201_vm7, %v212_v19  ;;  %216 = vst.msk [vmem:[#allocation2 + $0x7] sm:$0x8] %vm201_vm7, %v212_v19 }
 0x15e   :  { %215 = vst.msk [vmem:[#allocation2 + $0x2] sm:$0x80] %vm203_vm8, %v212_v19  ;;  %217 = vst.msk [vmem:[#allocation2 + $0x4] sm:$0x80] %vm203_vm8, %v212_v19 }
 0x15f   :  { %218 = vst.msk [vmem:[#allocation2 + $0x9] sm:$0x8] %vm201_vm7, %v212_v19  ;;  %220 = vst.msk [vmem:[#allocation2 + $0xb] sm:$0x8] %vm201_vm7, %v212_v19 }
 0x160   :  { %219 = vst.msk [vmem:[#allocation2 + $0x6] sm:$0x80] %vm203_vm8, %v212_v19  ;;  %221 = vst.msk [vmem:[#allocation2 + $0x8] sm:$0x80] %vm203_vm8, %v212_v19 }
 0x161   :  { %202 = vst.msk [vmem:[#allocation2 - $0x3] sm:$0x8] %vm201_vm7, %v199_v20  ;;  %205 = vst.msk [vmem:[#allocation2 - $0x1] sm:$0x8] %vm201_vm7, %v199_v20 }
 0x162   :  { %204 = vst.msk [vmem:[#allocation2 - $0x6] sm:$0x80] %vm203_vm8, %v199_v20  ;;  %206 = vst.msk [vmem:[#allocation2 - $0x4] sm:$0x80] %vm203_vm8, %v199_v20 }
 0x163   :  { %207 = vst.msk [vmem:[#allocation2 + $0x1] sm:$0x8] %vm201_vm7, %v199_v20  ;;  %209 = vst.msk [vmem:[#allocation2 + $0x3] sm:$0x8] %vm201_vm7, %v199_v20 }
 0x164   :  { %208 = vst.msk [vmem:[#allocation2 - $0x2] sm:$0x80] %vm203_vm8, %v199_v20  ;;  %210 = vst.msk [vmem:[#allocation2] sm:$0x80] %vm203_vm8, %v199_v20 }
 0x167   :  { %v223_v22 = vld [vmem:[#allocation2 + $0x8] sm:$0xff] }
 0x16b   :  { %v222_v21 = vld [vmem:[#allocation2] sm:$0xff] }
 0x16c   :  { %372 = vmatprep.mubr.msk.f32.mxu1 %vm48_vm0, %v222_v21 }
 0x16d   :  { %373 = vmatmul.mubr.msk.f32.vlgmr.msra.gmra.mxu1 %vm48_vm0, %v223_v22 }
 0x22d   :  { %v374_v24 = vpop.f32.mrf.mxu1 }
 0x22e   :  { %v313_v25 = vadd.f32 %v374_v24, %v338_v23 }
 0x22f   :  { %v307_v26 = vpop.f32.mrf.mxu1 }
 0x230   :  { %317 = vst.msk [vmem:[#allocation6 + $0x8] sm:$0xff] %vm48_vm0, %v313_v25  ;;  %v308_v27 = vadd.f32 %v338_v23, %v307_v26 }
 0x232   :  { %316 = vst.msk [vmem:[#allocation6] sm:$0xff] %vm48_vm0, %v308_v27 }
 0x233   :  { %412 = shalt.err (!%p409_p9)
}
 0x234   :  { %329 = dma.vmem_to_hbm [thread:$0]  %s324_s19, 256, %s580_s5, [#allocation5], %s426_s21, %s426_s21, %s427_s22  }
 0x235   :  { %423 = dma.done.wait [#allocation5], 256  }
 0x236   :  { %424 = vsyncadd [#allocation5], 4294967040 }
 0x237   :  { %333 = vsyncpa [#allocation4], 1 }
 0x238   :  { %334 = vsyncpa [#allocation5], 1 }

</bundles_post_ra>
